<compile_context>
chip_gen: v6e
topology: v6e:2x2x1
jax: 0.10.0
libtpu: 0.0.40
codegen_flags: <defaults>
</compile_context>

<pallas_src>
import jax
import jax.numpy as jnp
from jax.experimental import pallas as pl
from jax.experimental.pallas import tpu as pltpu

LANE = 128


def _round_up(x, m):
    return ((x + m - 1) // m) * m


def dqn_kernel(x_ref,
               w1_ref, b1_ref,
               w2_ref, b2_ref,
               w3_ref, b3_ref,
               w4_ref, b4_ref,
               out_ref):
    # Input comes straight from HBM as f32; cast to bf16 here (native MXU rate),
    # accumulate every layer in f32.
    x = x_ref[...].astype(jnp.bfloat16)
    # fc1 + ReLU
    h = jnp.dot(x, w1_ref[...], preferred_element_type=jnp.float32)
    h = jnp.maximum(h + b1_ref[...], 0.0).astype(jnp.bfloat16)
    # fc2 + ReLU
    h = jnp.dot(h, w2_ref[...], preferred_element_type=jnp.float32)
    h = jnp.maximum(h + b2_ref[...], 0.0).astype(jnp.bfloat16)
    # fc3 + ReLU
    h = jnp.dot(h, w3_ref[...], preferred_element_type=jnp.float32)
    h = jnp.maximum(h + b3_ref[...], 0.0).astype(jnp.bfloat16)
    # fc4 (no activation)
    h = jnp.dot(h, w4_ref[...], preferred_element_type=jnp.float32)
    out_ref[...] = (h + b4_ref[...]).astype(out_ref.dtype)


def _choose_tm(B, block_m):
    """Batch tile: big enough to amortize per-step overhead, small enough that
    large batches produce >=4 grid steps (v7x megacore load balance)."""
    if B <= 256:
        # Single full block; block dim == full array dim is always layout-legal.
        return B
    tm = _round_up(pl.cdiv(B, 4), 16)      # aim for >=4 grid steps
    tm = max(256, min(tm, block_m))        # but keep tiles >=256 rows, <=block_m
    return min(tm, B)


def dqn_forward(x, params, *, input_size, output_size, block_m=1024):
    """x: [B, input_size] f32. Returns [B, output_size] f32."""
    B = x.shape[0]
    out_pad = params["w4"].shape[1]

    tm = _choose_tm(B, block_m)
    grid = (pl.cdiv(B, tm),)

    def row_spec(shape):
        return pl.BlockSpec(shape, lambda i: (i, 0))

    def resident_spec(shape):
        # Constant block index -> stays in VMEM, no per-step re-DMA.
        return pl.BlockSpec(shape, lambda i: (0, 0))

    in_specs = [
        row_spec((tm, input_size)),  # raw f32 input rows, no wrapper-side pad slab
        resident_spec(params["w1"].shape), resident_spec(params["b1"].shape),
        resident_spec(params["w2"].shape), resident_spec(params["b2"].shape),
        resident_spec(params["w3"].shape), resident_spec(params["b3"].shape),
        resident_spec(params["w4"].shape), resident_spec(params["b4"].shape),
    ]

    out_full = pl.pallas_call(
        dqn_kernel,
        out_shape=jax.ShapeDtypeStruct((B, out_pad), jnp.bfloat16),  # bf16 writeback
        grid=grid,
        in_specs=in_specs,
        out_specs=row_spec((tm, out_pad)),
        compiler_params=pltpu.CompilerParams(
            dimension_semantics=("parallel",),
            vmem_limit_bytes=32 * 1024 * 1024),
    )(x,
      params["w1"], params["b1"],
      params["w2"], params["b2"],
      params["w3"], params["b3"],
      params["w4"], params["b4"])

    return out_full[:, :output_size].astype(jnp.float32)


def init_params(key, input_size, output_size):
    """PyTorch-style nn.Linear init; weights stored transposed [in, out].
    First layer keeps its true K (input_size, no padding); hidden/output
    widths are zero-padded to the 128-lane boundary.  Weights bf16, biases f32."""
    dims = [input_size, 64, 32, 16, output_size]
    params = {}
    for i in range(4):
        fan_in, fan_out = dims[i], dims[i + 1]
        in_p = fan_in if i == 0 else _round_up(fan_in, LANE)
        out_p = _round_up(fan_out, LANE)
        key, kw, kb = jax.random.split(key, 3)
        bound = 1.0 / jnp.sqrt(fan_in)
        w = jax.random.uniform(kw, (fan_in, fan_out), jnp.float32, -bound, bound)
        b = jax.random.uniform(kb, (fan_out,), jnp.float32, -bound, bound)
        w_pad = jnp.zeros((in_p, out_p), jnp.float32).at[:fan_in, :fan_out].set(w)
        b_pad = jnp.zeros((1, out_p), jnp.float32).at[0, :fan_out].set(b)
        params[f"w{i + 1}"] = w_pad.astype(jnp.bfloat16)
        params[f"b{i + 1}"] = b_pad  # f32 bias, added to the f32 accumulator
    return params


def dqn_reference(x, params, *, input_size, output_size):
    """Plain-JAX reference mirroring the kernel's bf16-operand / f32-accum /
    bf16-output math.  (Note: diverges from an all-f32 PyTorch DQN at the
    ~1e-3 level because operands are bf16.)"""
    h = x.astype(jnp.bfloat16)
    for i in range(1, 4):
        a = jnp.dot(h.astype(jnp.float32),
                    params[f"w{i}"].astype(jnp.float32)) + params[f"b{i}"]
        h = jnp.maximum(a, 0.0).astype(jnp.bfloat16)
    out = jnp.dot(h.astype(jnp.float32),
                  params["w4"].astype(jnp.float32)) + params["b4"]
    out = out.astype(jnp.bfloat16).astype(jnp.float32)
    return out[:, :output_size]


if __name__ == "__main__":
    key = jax.random.PRNGKey(0)
    input_size, output_size, batch = 8, 4, 4

    key, kx, kp = jax.random.split(key, 3)
    x = jax.random.normal(kx, (batch, input_size), jnp.float32)
    params = init_params(kp, input_size, output_size)

    out = dqn_forward(x, params, input_size=input_size, output_size=output_size)
    jax.block_until_ready(out)

    ref = dqn_reference(x, params, input_size=input_size, output_size=output_size)
    assert out.shape == (batch, output_size)
    assert jnp.allclose(out, ref, atol=1e-2, rtol=1e-2), \
        float(jnp.max(jnp.abs(out - ref)))

    print("KERNEL_OK")
</pallas_src>

<mosaic_0001>
module attributes {stable_mosaic.version = 11 : i64} {
  func.func @dqn_kernel(%arg0: i32, %arg1: memref<4x8xf32, #tpu.memory_space<vmem>>, %arg2: memref<8x128xbf16, #tpu.memory_space<vmem>>, %arg3: memref<1x128xf32, #tpu.memory_space<vmem>>, %arg4: memref<128x128xbf16, #tpu.memory_space<vmem>>, %arg5: memref<1x128xf32, #tpu.memory_space<vmem>>, %arg6: memref<128x128xbf16, #tpu.memory_space<vmem>>, %arg7: memref<1x128xf32, #tpu.memory_space<vmem>>, %arg8: memref<128x128xbf16, #tpu.memory_space<vmem>>, %arg9: memref<1x128xf32, #tpu.memory_space<vmem>>, %arg10: memref<4x128xbf16, #tpu.memory_space<vmem>>) attributes {dimension_semantics = [#tpu.dimension_semantics<parallel>], iteration_bounds = array<i64: 1>, scalar_prefetch = 0 : i64, scratch_operands = 0 : i64, tpu.core_type = #tpu.core_type<tc>, window_params = [{transform_indices = @transform_0, window_bounds = array<i64: 4, 8>}, {pipeline_mode = #tpu.pipeline_mode<synchronous>, transform_indices = @transform_1, window_bounds = array<i64: 8, 128>}, {pipeline_mode = #tpu.pipeline_mode<synchronous>, transform_indices = @transform_2, window_bounds = array<i64: 1, 128>}, {pipeline_mode = #tpu.pipeline_mode<synchronous>, transform_indices = @transform_3, window_bounds = array<i64: 128, 128>}, {pipeline_mode = #tpu.pipeline_mode<synchronous>, transform_indices = @transform_4, window_bounds = array<i64: 1, 128>}, {pipeline_mode = #tpu.pipeline_mode<synchronous>, transform_indices = @transform_5, window_bounds = array<i64: 128, 128>}, {pipeline_mode = #tpu.pipeline_mode<synchronous>, transform_indices = @transform_6, window_bounds = array<i64: 1, 128>}, {pipeline_mode = #tpu.pipeline_mode<synchronous>, transform_indices = @transform_7, window_bounds = array<i64: 128, 128>}, {pipeline_mode = #tpu.pipeline_mode<synchronous>, transform_indices = @transform_8, window_bounds = array<i64: 1, 128>}, {transform_indices = @transform_9, window_bounds = array<i64: 4, 128>}]} {
    %c0 = arith.constant 0 : index
    %c0_0 = arith.constant 0 : index
    %0 = vector.load %arg1[%c0, %c0_0] : memref<4x8xf32, #tpu.memory_space<vmem>>, vector<4x8xf32>
    %1 = arith.truncf %0 : vector<4x8xf32> to vector<4x8xbf16>
    %c0_1 = arith.constant 0 : index
    %c0_2 = arith.constant 0 : index
    %2 = vector.load %arg2[%c0_1, %c0_2] : memref<8x128xbf16, #tpu.memory_space<vmem>>, vector<8x128xbf16>
    %cst = arith.constant dense<0.000000e+00> : vector<4x128xf32>
    %3 = tpu.matmul %1, %2, %cst {dimension_numbers = #tpu.dot_dimension_numbers<[1], [0], [0], [1], [0, 0, 1, 1], [], []>} : vector<4x8xbf16>, vector<8x128xbf16>, vector<4x128xf32> -> vector<4x128xf32>
    %c0_3 = arith.constant 0 : index
    %c0_4 = arith.constant 0 : index
    %4 = vector.load %arg3[%c0_3, %c0_4] : memref<1x128xf32, #tpu.memory_space<vmem>>, vector<1x128xf32>
    %5 = vector.broadcast %4 : vector<1x128xf32> to vector<4x128xf32>
    %6 = arith.addf %3, %5 : vector<4x128xf32>
    %cst_5 = arith.constant 0.000000e+00 : f32
    %7 = vector.broadcast %cst_5 : f32 to vector<4x128xf32>
    %8 = arith.maximumf %6, %7 : vector<4x128xf32>
    %9 = arith.truncf %8 : vector<4x128xf32> to vector<4x128xbf16>
    %c0_6 = arith.constant 0 : index
    %c0_7 = arith.constant 0 : index
    %10 = vector.load %arg4[%c0_6, %c0_7] : memref<128x128xbf16, #tpu.memory_space<vmem>>, vector<128x128xbf16>
    %cst_8 = arith.constant dense<0.000000e+00> : vector<4x128xf32>
    %11 = tpu.matmul %9, %10, %cst_8 {dimension_numbers = #tpu.dot_dimension_numbers<[1], [0], [0], [1], [0, 0, 1, 1], [], []>} : vector<4x128xbf16>, vector<128x128xbf16>, vector<4x128xf32> -> vector<4x128xf32>
    %c0_9 = arith.constant 0 : index
    %c0_10 = arith.constant 0 : index
    %12 = vector.load %arg5[%c0_9, %c0_10] : memref<1x128xf32, #tpu.memory_space<vmem>>, vector<1x128xf32>
    %13 = vector.broadcast %12 : vector<1x128xf32> to vector<4x128xf32>
    %14 = arith.addf %11, %13 : vector<4x128xf32>
    %cst_11 = arith.constant 0.000000e+00 : f32
    %15 = vector.broadcast %cst_11 : f32 to vector<4x128xf32>
    %16 = arith.maximumf %14, %15 : vector<4x128xf32>
    %17 = arith.truncf %16 : vector<4x128xf32> to vector<4x128xbf16>
    %c0_12 = arith.constant 0 : index
    %c0_13 = arith.constant 0 : index
    %18 = vector.load %arg6[%c0_12, %c0_13] : memref<128x128xbf16, #tpu.memory_space<vmem>>, vector<128x128xbf16>
    %cst_14 = arith.constant dense<0.000000e+00> : vector<4x128xf32>
    %19 = tpu.matmul %17, %18, %cst_14 {dimension_numbers = #tpu.dot_dimension_numbers<[1], [0], [0], [1], [0, 0, 1, 1], [], []>} : vector<4x128xbf16>, vector<128x128xbf16>, vector<4x128xf32> -> vector<4x128xf32>
    %c0_15 = arith.constant 0 : index
    %c0_16 = arith.constant 0 : index
    %20 = vector.load %arg7[%c0_15, %c0_16] : memref<1x128xf32, #tpu.memory_space<vmem>>, vector<1x128xf32>
    %21 = vector.broadcast %20 : vector<1x128xf32> to vector<4x128xf32>
    %22 = arith.addf %19, %21 : vector<4x128xf32>
    %cst_17 = arith.constant 0.000000e+00 : f32
    %23 = vector.broadcast %cst_17 : f32 to vector<4x128xf32>
    %24 = arith.maximumf %22, %23 : vector<4x128xf32>
    %25 = arith.truncf %24 : vector<4x128xf32> to vector<4x128xbf16>
    %c0_18 = arith.constant 0 : index
    %c0_19 = arith.constant 0 : index
    %26 = vector.load %arg8[%c0_18, %c0_19] : memref<128x128xbf16, #tpu.memory_space<vmem>>, vector<128x128xbf16>
    %cst_20 = arith.constant dense<0.000000e+00> : vector<4x128xf32>
    %27 = tpu.matmul %25, %26, %cst_20 {dimension_numbers = #tpu.dot_dimension_numbers<[1], [0], [0], [1], [0, 0, 1, 1], [], []>} : vector<4x128xbf16>, vector<128x128xbf16>, vector<4x128xf32> -> vector<4x128xf32>
    %c0_21 = arith.constant 0 : index
    %c0_22 = arith.constant 0 : index
    %28 = vector.load %arg9[%c0_21, %c0_22] : memref<1x128xf32, #tpu.memory_space<vmem>>, vector<1x128xf32>
    %29 = vector.broadcast %28 : vector<1x128xf32> to vector<4x128xf32>
    %30 = arith.addf %27, %29 : vector<4x128xf32>
    %31 = arith.truncf %30 : vector<4x128xf32> to vector<4x128xbf16>
    %c0_23 = arith.constant 0 : index
    %c0_24 = arith.constant 0 : index
    %32 = vector.load %arg10[%c0_23, %c0_24] : memref<4x128xbf16, #tpu.memory_space<vmem>>, vector<4x128xbf16>
    tpu.vector_store %arg10[%c0_23, %c0_24], %31 {strides = array<i32>} : memref<4x128xbf16, #tpu.memory_space<vmem>>, vector<4x128xbf16>,
    return
  }
  func.func @transform_0(%arg0: i32) -> (i32, i32) {
    %c0_i32 = arith.constant 0 : i32
    %c0_i32_0 = arith.constant 0 : i32
    return %arg0, %c0_i32 : i32, i32
  }
  func.func @transform_1(%arg0: i32) -> (i32, i32) {
    %c0_i32 = arith.constant 0 : i32
    %c0_i32_0 = arith.constant 0 : i32
    %c0_i32_1 = arith.constant 0 : i32
    return %c0_i32, %c0_i32_0 : i32, i32
  }
  func.func @transform_2(%arg0: i32) -> (i32, i32) {
    %c0_i32 = arith.constant 0 : i32
    %c0_i32_0 = arith.constant 0 : i32
    %c0_i32_1 = arith.constant 0 : i32
    return %c0_i32, %c0_i32_0 : i32, i32
  }
  func.func @transform_3(%arg0: i32) -> (i32, i32) {
    %c0_i32 = arith.constant 0 : i32
    %c0_i32_0 = arith.constant 0 : i32
    %c0_i32_1 = arith.constant 0 : i32
    return %c0_i32, %c0_i32_0 : i32, i32
  }
  func.func @transform_4(%arg0: i32) -> (i32, i32) {
    %c0_i32 = arith.constant 0 : i32
    %c0_i32_0 = arith.constant 0 : i32
    %c0_i32_1 = arith.constant 0 : i32
    return %c0_i32, %c0_i32_0 : i32, i32
  }
  func.func @transform_5(%arg0: i32) -> (i32, i32) {
    %c0_i32 = arith.constant 0 : i32
    %c0_i32_0 = arith.constant 0 : i32
    %c0_i32_1 = arith.constant 0 : i32
    return %c0_i32, %c0_i32_0 : i32, i32
  }
  func.func @transform_6(%arg0: i32) -> (i32, i32) {
    %c0_i32 = arith.constant 0 : i32
    %c0_i32_0 = arith.constant 0 : i32
    %c0_i32_1 = arith.constant 0 : i32
    return %c0_i32, %c0_i32_0 : i32, i32
  }
  func.func @transform_7(%arg0: i32) -> (i32, i32) {
    %c0_i32 = arith.constant 0 : i32
    %c0_i32_0 = arith.constant 0 : i32
    %c0_i32_1 = arith.constant 0 : i32
    return %c0_i32, %c0_i32_0 : i32, i32
  }
  func.func @transform_8(%arg0: i32) -> (i32, i32) {
    %c0_i32 = arith.constant 0 : i32
    %c0_i32_0 = arith.constant 0 : i32
    %c0_i32_1 = arith.constant 0 : i32
    return %c0_i32, %c0_i32_0 : i32, i32
  }
  func.func @transform_9(%arg0: i32) -> (i32, i32) {
    %c0_i32 = arith.constant 0 : i32
    %c0_i32_0 = arith.constant 0 : i32
    return %arg0, %c0_i32 : i32, i32
  }
}

</mosaic_0001>

<bundles_post_ra>
// kernel: tpu_custom_call.1
= control target key start
LH: loop header
LB: loop body
LE: loop exit
PB: predicated region body
PF: predicated region fallthrough
CT: control target
= control target key end

     0   :  { %14 = vsyncpa [#allocation3], 0  ;;  %s932_s0 = inlined_call_operand.hbm [shape: f32[4,8], index: 0, kind: input, shape index: {}]   ;;  %s933_s1 = inlined_call_operand.hbm [shape: bf16[8,128], index: 1, kind: input, shape index: {}]   ;;  %s934_s2 = inlined_call_operand.vmem [shape: f32[1,128], index: 2, kind: input, shape index: {}]   ;;  %s935_s3 = inlined_call_operand.hbm [shape: bf16[128,128], index: 3, kind: input, shape index: {}]   ;;  %s936_s4 = inlined_call_operand.vmem [shape: f32[1,128], index: 4, kind: input, shape index: {}]   ;;  %s937_s5 = inlined_call_operand.hbm [shape: bf16[128,128], index: 5, kind: input, shape index: {}]   ;;  %s938_s6 = inlined_call_operand.vmem [shape: f32[1,128], index: 6, kind: input, shape index: {}]   ;;  %s939_s7 = inlined_call_operand.hbm [shape: bf16[128,128], index: 7, kind: input, shape index: {}]   ;;  %s940_s8 = inlined_call_operand.vmem [shape: f32[1,128], index: 8, kind: input, shape index: {}]   ;;  %s941_s9 = inlined_call_operand.hbm [shape: bf16[4,128], index: 9, kind: output, shape index: {}]  }
   0x1   :  { %15 = vsyncpa [#allocation6], 0 }
   0x2   :  { %16 = vsyncpa [#allocation9], 0 }
   0x3   :  { %17 = vsyncpa [#allocation4], 0  ;;  %s800_s30 = smov [#allocation5]  }
   0x4   :  { %s34_s10 = sshll.u32 %s800_s30, 4  ;;  %s35_s10 = int_to_ptr.vmem [resolvable:$true] %s34_s10 }
   0x5   :  { %s680_s11 = scalar_lea.vmem %s35_s10, 64  ;;  %p685_p1 = scmp.lt.s32.totalorder %s35_s10, %s35_s10 }
   0x6   :  { %p681_p0 = scmp.ne.s32.totalorder %s35_s10, %s680_s11  ;;  %p686_p2 = scmp.lt.s32.totalorder %s680_s11, %s680_s11 }
   0x8   :  { %p687_p3 = por %p686_p2, %p685_p1 }
   0xa   :  { %p688_p4 = pnand %p687_p3, %p681_p0 }
   0xc   :  { %691 = shalt.err (!%p688_p4)
}
   0xd   :  { %37 = dma.hbm_to_vmem [thread:$0]  %s933_s1, 64, %s35_s10, [#allocation6]  }
   0xe   :  { %s801_s14 = smov [#allocation8]   ;;  %s802_s16 = smov [#allocation2]  }
   0xf   :  { %s59_s15 = sshll.u32 %s801_s14, 4  ;;  %s24_s17 = sshll.u32 %s802_s16, 4  ;;  %s60_s15 = int_to_ptr.vmem [resolvable:$true] %s59_s15  ;;  %s25_s17 = int_to_ptr.vmem [resolvable:$true] %s24_s17 }
  0x10   :  { %s700_s18 = scalar_lea.vmem %s60_s15, 1024  ;;  %p705_p6 = scmp.lt.s32.totalorder %s60_s15, %s60_s15 }
  0x11   :  { %p701_p5 = scmp.ne.s32.totalorder %s60_s15, %s700_s18  ;;  %p706_p7 = scmp.lt.s32.totalorder %s700_s18, %s700_s18 }
  0x13   :  { %p707_p8 = por %p706_p7, %p705_p6 }
  0x15   :  { %p708_p9 = pnand %p707_p8, %p701_p5 }
  0x17   :  { %711 = shalt.err (!%p708_p9)
}
  0x18   :  { %s803_s19 = smov 64   ;;  %s804_s20 = smov 4  }
  0x19   :  { %65 = dma.hbm_to_vmem [thread:$0]  %s937_s5, 1024, %s60_s15, [#allocation9], %s803_s19, %s803_s19, %s804_s20  }
  0x1a   :  { %s720_s1 = scalar_lea.vmem %s25_s17, 64  ;;  %p725_p11 = scmp.lt.s32.totalorder %s25_s17, %s25_s17 }
  0x1b   :  { %p721_p10 = scmp.ne.s32.totalorder %s25_s17, %s720_s1  ;;  %p726_p12 = scmp.lt.s32.totalorder %s720_s1, %s720_s1 }
  0x1d   :  { %p727_p13 = por %p726_p12, %p725_p11 }
  0x1f   :  { %p728_p0 = pnand %p727_p13, %p721_p10 }
  0x21   :  { %731 = shalt.err (!%p728_p0)
}
  0x22   :  { %27 = dma.hbm_to_vmem [thread:$0]  %s932_s0, 64, %s25_s17, [#allocation3]  }
  0x23   :  { %s805_s25 = smov [#allocation7]   ;;  %s806_s27 = smov [#allocation10]  }
  0x24   :  { %s45_s26 = sshll.u32 %s805_s25, 4  ;;  %s73_s28 = sshll.u32 %s806_s27, 4  ;;  %s46_s26 = int_to_ptr.vmem [resolvable:$true] %s45_s26  ;;  %s74_s28 = int_to_ptr.vmem [resolvable:$true] %s73_s28 }
  0x25   :  { %s740_s29 = scalar_lea.vmem %s46_s26, 1024  ;;  %p745_p2 = scmp.lt.s32.totalorder %s46_s26, %s46_s26 }
  0x26   :  { %p741_p1 = scmp.ne.s32.totalorder %s46_s26, %s740_s29  ;;  %p746_p3 = scmp.lt.s32.totalorder %s740_s29, %s740_s29 }
  0x28   :  { %p747_p4 = por %p746_p3, %p745_p2 }
  0x2a   :  { %p748_p5 = pnand %p747_p4, %p741_p1 }
  0x2c   :  { %751 = shalt.err (!%p748_p5)
}
  0x2d   :  { %51 = dma.hbm_to_vmem [thread:$0]  %s935_s3, 1024, %s46_s26, [#allocation6], %s803_s19, %s803_s19, %s804_s20  }
  0x2e   :  { %s760_s0 = scalar_lea.vmem %s74_s28, 1024  ;;  %p765_p7 = scmp.lt.s32.totalorder %s74_s28, %s74_s28 }
  0x2f   :  { %p761_p6 = scmp.ne.s32.totalorder %s74_s28, %s760_s0  ;;  %p766_p8 = scmp.lt.s32.totalorder %s760_s0, %s760_s0 }
  0x31   :  { %p767_p9 = por %p766_p8, %p765_p7 }
  0x33   :  { %p768_p10 = pnand %p767_p9, %p761_p6 }
  0x35   :  { %771 = shalt.err (!%p768_p10)
}
  0x36   :  { %79 = dma.hbm_to_vmem [thread:$0]  %s939_s7, 1024, %s74_s28, [#allocation9], %s803_s19, %s803_s19, %s804_s20  }
  0x37   :  { %792 = dma.done.wait [#allocation3], 64  }
  0x38   :  { %793 = vsyncadd [#allocation3], 4294967232 }
  0x39   :  { %794 = dma.done.wait [#allocation6], 1088  }
  0x3a   :  { %795 = vsyncadd [#allocation6], 4294966208 }
  0x3b   :  { %796 = dma.done.wait [#allocation9], 2048  }
  0x3c   :  { %797 = vsyncadd [#allocation9], 4294965248  ;;  %v807_v0 = vmov 0.0   ;;  %vm808_vm0 = vmmov 0   ;;  %vm112_vm1 = vcmask 1043456   ;;  %v648_v5 = vld [vmem:[#allocation7 + $0x38] sm:$0xff]  }
  0x3d   :  { %572 = vmatprep.subr.bf16.mxu0 %v807_v0  ;;  %574 = vmatprep.mubr.msk.bf16.mxu0 %vm808_vm0, %v807_v0  ;;  %v100_v1 = vld [vmem:[#allocation5] sm:$0xf]  ;;  %v98_v2 = vld [vmem:[#allocation2] sm:$0xf]  ;;  %vm108_vm2 = vcmask 64512   ;;  %v649_v6 = vld [vmem:[#allocation7 + $0x30] sm:$0xff]  }
  0x3e   :  { %578 = vmatprep.subr.bf16.mxu1 %v807_v0  ;;  %594 = vmatprep.mubr.msk.bf16.mxu1 %vm808_vm0, %v807_v0  ;;  %v114_v3 = vsel %vm112_vm1, %v100_v1, 0  ;;  %v99_v4 = vpack.c.bf16 %v98_v2, %v98_v2  ;;  %v650_v7 = vld [vmem:[#allocation7 + $0x28] sm:$0xff]   ;;  %v651_v8 = vld [vmem:[#allocation7 + $0x20] sm:$0xff]   ;;  %v652_v9 = vld [vmem:[#allocation7 + $0x18] sm:$0xff]   ;;  %s809_s16 = smov [#allocation11]  }
  0x3f   :  { %573 = vmatpush3.bf16.msra.mxu0 %v114_v3  ;;  %579 = vmatpush3.bf16.msra.mxu1 %v648_v5  ;;  %v653_v10 = vld [vmem:[#allocation7 + $0x10] sm:$0xff]   ;;  %v654_v11 = vld [vmem:[#allocation7 + $0x8] sm:$0xff]   ;;  %v655_v12 = vld [vmem:[#allocation7] sm:$0xff]   ;;  %s503_s17 = sshll.u32 %s809_s16, 4  ;;  %s504_s17 = int_to_ptr.vmem [resolvable:$true] %s503_s17 }
  0x40   :  { %598 = vmatprep.subr.bf16.mxu0 %v807_v0  ;;  %580 = vmatprep.subr.bf16.mxu1 %v807_v0  ;;  %v656_v13 = vld [vmem:[#allocation8 + $0x38] sm:$0xff]   ;;  %v657_v14 = vld [vmem:[#allocation8 + $0x30] sm:$0xff]   ;;  %v658_v15 = vld [vmem:[#allocation8 + $0x28] sm:$0xff]   ;;  %p777_p12 = scmp.lt.s32.totalorder %s504_s17, %s504_s17 }
  0x41   :  { %v659_v16 = vld [vmem:[#allocation8 + $0x20] sm:$0xff]   ;;  %v660_v17 = vld [vmem:[#allocation8 + $0x18] sm:$0xff]   ;;  %v661_v18 = vld [vmem:[#allocation8 + $0x10] sm:$0xff]  }
  0x42   :  { %575 = vmatmul.mubr.msk.bf16.vlgmr.msra.gmra.mxu0 %vm108_vm2, %v99_v4  ;;  %v514_v19 = vld [vmem:[%s934_s2] ss:$0 sm:$0xff]  ;;  %v662_v27 = vld [vmem:[#allocation8 + $0x8] sm:$0xff]   ;;  %v663_v28 = vld [vmem:[#allocation8] sm:$0xff]  }
  0x43   :  { %614 = vmatprep.mubr.msk.bf16.mxu0 %vm808_vm0, %v807_v0  ;;  %581 = vmatpush3.bf16.msra.mxu1 %v649_v6  ;;  %v664_v29 = vld [vmem:[#allocation10 + $0x38] sm:$0xff]   ;;  %v665_v30 = vld [vmem:[#allocation10 + $0x30] sm:$0xff]   ;;  %v666_v31 = vld [vmem:[#allocation10 + $0x28] sm:$0xff]  }
  0x44   :  { %582 = vmatprep.subr.bf16.mxu1 %v807_v0  ;;  %599 = vmatpush3.bf16.msra.mxu0 %v656_v13  ;;  %v667_v32 = vld [vmem:[#allocation10 + $0x20] sm:$0xff]   ;;  %v668_v33 = vld [vmem:[#allocation10 + $0x18] sm:$0xff]   ;;  %v669_v34 = vld [vmem:[#allocation10 + $0x10] sm:$0xff]  }
  0x45   :  { %600 = vmatprep.subr.bf16.mxu0 %v807_v0  ;;  %v516_v35 = vld [vmem:[%s936_s4] ss:$0 sm:$0xff]  ;;  %v670_v43 = vld [vmem:[#allocation10 + $0x8] sm:$0xff]   ;;  %v671_v44 = vld [vmem:[#allocation10] sm:$0xff]  }
  0x46   :  { %v525_v45 = vld [vmem:[%s938_s6] ss:$0 sm:$0xff]  ;;  %s772_s6 = scalar_lea.vmem %s504_s17, 32 }
  0x47   :  { %583 = vmatpush3.bf16.msra.mxu1 %v650_v7  ;;  %v534_v53 = vld [vmem:[%s940_s8] ss:$0 sm:$0xff]  ;;  %p773_p11 = scmp.ne.s32.totalorder %s504_s17, %s772_s6  ;;  %p778_p13 = scmp.lt.s32.totalorder %s772_s6, %s772_s6 }
  0x48   :  { %584 = vmatprep.subr.bf16.mxu1 %v807_v0  ;;  %601 = vmatpush3.bf16.msra.mxu0 %v657_v14 }
  0x49   :  { %602 = vmatprep.subr.bf16.mxu0 %v807_v0  ;;  %p779_p0 = por %p778_p13, %p777_p12 }
  0x4b   :  { %585 = vmatpush3.bf16.msra.mxu1 %v651_v8  ;;  %p780_p1 = pnand %p779_p0, %p773_p11 }
  0x4c   :  { %586 = vmatprep.subr.bf16.mxu1 %v807_v0  ;;  %603 = vmatpush3.bf16.msra.mxu0 %v658_v15 }
  0x4d   :  { %604 = vmatprep.subr.bf16.mxu0 %v807_v0 }
  0x4f   :  { %587 = vmatpush3.bf16.msra.mxu1 %v652_v9 }
  0x50   :  { %588 = vmatprep.subr.bf16.mxu1 %v807_v0  ;;  %605 = vmatpush3.bf16.msra.mxu0 %v659_v16 }
  0x51   :  { %606 = vmatprep.subr.bf16.mxu0 %v807_v0 }
  0x53   :  { %589 = vmatpush3.bf16.msra.mxu1 %v653_v10 }
  0x54   :  { %590 = vmatprep.subr.bf16.mxu1 %v807_v0  ;;  %607 = vmatpush3.bf16.msra.mxu0 %v660_v17 }
  0x55   :  { %608 = vmatprep.subr.bf16.mxu0 %v807_v0 }
  0x57   :  { %591 = vmatpush3.bf16.msra.mxu1 %v654_v11 }
  0x58   :  { %592 = vmatprep.subr.bf16.mxu1 %v807_v0  ;;  %609 = vmatpush3.bf16.msra.mxu0 %v661_v18 }
  0x59   :  { %610 = vmatprep.subr.bf16.mxu0 %v807_v0 }
  0x5b   :  { %593 = vmatpush3.bf16.msra.mxu1 %v655_v12 }
  0x5c   :  { %618 = vmatprep.subr.bf16.mxu1 %v807_v0  ;;  %611 = vmatpush3.bf16.msra.mxu0 %v662_v27 }
  0x5d   :  { %612 = vmatprep.subr.bf16.mxu0 %v807_v0 }
  0x60   :  { %613 = vmatpush3.bf16.msra.mxu0 %v663_v28 }
 0x102   :  { %v150_v20 = vpop.f32.mrf.mxu0 }
 0x103   :  { %v151_v21 = vadd.f32 %v514_v19, %v150_v20 }
 0x104   :  { %v576_v22 = vpop.f32.mrf.mxu0 }
 0x105   :  { %v156_v23 = vmax.f32 %v151_v21, 0.0 }
 0x106   :  { %v153_v24 = vpop.f32.mrf.mxu0 }
 0x107   :  { %v157_v25 = vpack.c.bf16 %v156_v23, %v156_v23 }
 0x108   :  { %v577_v26 = vpop.f32.mrf.mxu0 }
 0x109   :  { %595 = vmatmul.mubr.bf16.vlgmr.msra.gmra.mxu1 %v157_v25 }
 0x10a   :  { %634 = vmatprep.mubr.msk.bf16.mxu1 %vm808_vm0, %v807_v0  ;;  %619 = vmatpush3.bf16.msra.mxu1 %v664_v29 }
 0x10b   :  { %620 = vmatprep.subr.bf16.mxu1 %v807_v0 }
 0x10e   :  { %621 = vmatpush3.bf16.msra.mxu1 %v665_v30 }
 0x10f   :  { %622 = vmatprep.subr.bf16.mxu1 %v807_v0 }
 0x112   :  { %623 = vmatpush3.bf16.msra.mxu1 %v666_v31 }
 0x113   :  { %624 = vmatprep.subr.bf16.mxu1 %v807_v0 }
 0x116   :  { %625 = vmatpush3.bf16.msra.mxu1 %v667_v32 }
 0x117   :  { %626 = vmatprep.subr.bf16.mxu1 %v807_v0 }
 0x11a   :  { %627 = vmatpush3.bf16.msra.mxu1 %v668_v33 }
 0x11b   :  { %628 = vmatprep.subr.bf16.mxu1 %v807_v0 }
 0x11e   :  { %629 = vmatpush3.bf16.msra.mxu1 %v669_v34 }
 0x11f   :  { %630 = vmatprep.subr.bf16.mxu1 %v807_v0 }
 0x122   :  { %631 = vmatpush3.bf16.msra.mxu1 %v670_v43 }
 0x123   :  { %632 = vmatprep.subr.bf16.mxu1 %v807_v0 }
 0x126   :  { %633 = vmatpush3.bf16.msra.mxu1 %v671_v44 }
 0x1c9   :  { %v263_v36 = vpop.f32.mrf.mxu1 }
 0x1ca   :  { %v264_v37 = vadd.f32 %v516_v35, %v263_v36 }
 0x1cb   :  { %v596_v38 = vpop.f32.mrf.mxu1 }
 0x1cc   :  { %v269_v39 = vmax.f32 %v264_v37, 0.0 }
 0x1cd   :  { %v266_v40 = vpop.f32.mrf.mxu1 }
 0x1ce   :  { %v270_v41 = vpack.c.bf16 %v269_v39, %v269_v39 }
 0x1cf   :  { %v597_v42 = vpop.f32.mrf.mxu1 }
 0x1d0   :  { %615 = vmatmul.mubr.bf16.vlgmr.msra.gmra.mxu0 %v270_v41 }
 0x290   :  { %v376_v46 = vpop.f32.mrf.mxu0 }
 0x291   :  { %v377_v47 = vadd.f32 %v525_v45, %v376_v46 }
 0x292   :  { %v616_v48 = vpop.f32.mrf.mxu0 }
 0x293   :  { %v382_v49 = vmax.f32 %v377_v47, 0.0 }
 0x294   :  { %v379_v50 = vpop.f32.mrf.mxu0 }
 0x295   :  { %v383_v51 = vpack.c.bf16 %v382_v49, %v382_v49 }
 0x296   :  { %v617_v52 = vpop.f32.mrf.mxu0 }
 0x297   :  { %635 = vmatmul.mubr.bf16.vlgmr.msra.gmra.mxu1 %v383_v51 }
 0x357   :  { %v489_v54 = vpop.f32.mrf.mxu1 }
 0x358   :  { %v490_v55 = vadd.f32 %v534_v53, %v489_v54 }
 0x359   :  { %v636_v56 = vpop.f32.mrf.mxu1 }
 0x35a   :  { %v495_v57 = vpack.c.bf16 %v490_v55, %v490_v55 }
 0x35b   :  { %v492_v58 = vpop.f32.mrf.mxu1 }
 0x35c   :  { %496 = vst [vmem:[#allocation11] sm:$0x3] %v495_v57 }
 0x35d   :  { %v637_v59 = vpop.f32.mrf.mxu1 }
 0x35e   :  { %783 = shalt.err (!%p780_p1)
}
 0x35f   :  { %506 = dma.vmem_to_hbm [thread:$0]  %s504_s17, 32, %s941_s9, [#allocation4]  }
 0x360   :  { %798 = dma.done.wait [#allocation4], 32  }
 0x361   :  { %799 = vsyncadd [#allocation4], 4294967264 }
 0x362   :  { %510 = vsyncpa [#allocation3], 1 }
 0x363   :  { %511 = vsyncpa [#allocation6], 1 }
 0x364   :  { %512 = vsyncpa [#allocation9], 1 }
 0x365   :  { %513 = vsyncpa [#allocation4], 1 }

</bundles_post_ra>
